<compile_context>
chip_gen: v7x
topology: tpu7x:2x2x1
jax: 0.10.0
libtpu: 0.0.40
codegen_flags: <defaults>
</compile_context>

<pallas_src>
import jax
import jax.numpy as jnp
from jax import lax
from jax.experimental import pallas as pl
from jax.experimental.pallas import tpu as pltpu


def _round_up(x, m):
    return ((x + m - 1) // m) * m


# ---------------------------------------------------------------------------
# Static packing layout (shared by pack_params and the kernel)
# ---------------------------------------------------------------------------
def make_layout(L, F, H, NL):
    Din = 2 * L + 1
    Din_pad = _round_up(Din, 8)

    # weight blob: row-stacked sections, lane width WL, bf16
    WL = _round_up(max(4 * H, 2 * F, 2 * L), 128)
    gru_off, gru_k1 = [], []
    row = 0
    for l in range(NL):
        in_l = F if l == 0 else H
        k1 = in_l + H                       # per-branch K half
        gru_off.append(row)
        gru_k1.append(k1)
        row += _round_up(2 * k1, 8)
    w1_off = row
    row += Din_pad
    w2_off = row
    row += _round_up(H, 8)
    w3_off = row
    row += _round_up(F, 8)
    w_rows = _round_up(row, 8)

    # bias blob: (4B rows, lane sections of width SW), f32
    SW = _round_up(max(2 * F, 2 * L, 4 * H), 128)
    b1_off, b2_off, b3_off = 0, SW, 2 * SW
    gb_off = [3 * SW + l * SW for l in range(NL)]
    b_lanes = (3 + NL) * SW

    return dict(Din=Din, Din_pad=Din_pad, WL=WL, w_rows=w_rows,
                gru_off=gru_off, gru_k1=gru_k1,
                w1_off=w1_off, w2_off=w2_off, w3_off=w3_off,
                SW=SW, b1_off=b1_off, b2_off=b2_off, b3_off=b3_off,
                gb_off=gb_off, b_lanes=b_lanes)


# ---------------------------------------------------------------------------
# Pallas kernel
# ---------------------------------------------------------------------------
def make_kgnet_kernel(B, L, F, H, NL, lay):
    """Merged row layout (4B rows):
         rows 0:B   -> (gru_r, real stream)   rows 2B:3B -> (gru_i, imag stream)
         rows B:2B  -> (gru_r, imag stream)   rows 3B:4B -> (gru_i, real stream)
    """
    fourB, twoB = 4 * B, 2 * B

    def kernel(x_ref, h0_ref, w_ref, b_ref, alpha_ref, out_ref, hout_ref):
        a1 = alpha_ref[0]                    # PReLU alphas in SMEM
        a2 = alpha_ref[1]

        def mm(a, b):
            # feed the MXU bf16; accumulate / everything else in f32
            return jnp.dot(a.astype(jnp.bfloat16), b.astype(jnp.bfloat16),
                           preferred_element_type=jnp.float32)

        def prelu(v, a):
            return jnp.where(v >= 0, v, a * v)

        row_F = lax.broadcasted_iota(jnp.int32, (fourB, F), 0)
        # rows carrying the real input stream: [0:B) and [3B:4B)
        real_rows = (row_F < B) | (row_F >= 3 * B)

        # ---- fc_in: one matmul for all four (branch, stream) row blocks ----
        w1 = w_ref[lay["w1_off"]:lay["w1_off"] + lay["Din_pad"], 0:2 * F]
        b1 = b_ref[:, lay["b1_off"]:lay["b1_off"] + 2 * F]
        xw = mm(x_ref[...], w1) + b1                                # (4B, 2F)
        feat = prelu(jnp.where(real_rows, xw[:, 0:F], xw[:, F:2 * F]), a1)

        # ---- one-step multi-layer GRU: ONE fused matmul per layer ----------
        # LHS lanes = [act | h | act | h]; rows 0:2B keep the first (gru_r)
        # K-half, rows 2B:4B keep the second (gru_i) K-half.  RHS columns are
        # [r_sum | z_sum | gi_n | gh_n], biases pre-added via the bias blob.
        h_state = h0_ref[...]                                       # (4B, NL*H)
        mask_cache = {}

        def branch_mask(k1):
            if k1 not in mask_cache:
                k = 2 * k1
                rowk = lax.broadcasted_iota(jnp.int32, (fourB, k), 0)
                colk = lax.broadcasted_iota(jnp.int32, (fourB, k), 1)
                mask_cache[k1] = (rowk < twoB) == (colk < k1)
            return mask_cache[k1]

        out = feat
        layer_outs = []
        for l in range(NL):
            k1 = lay["gru_k1"][l]
            k = 2 * k1
            h = h_state[:, l * H:(l + 1) * H]                       # (4B, H)
            both = jnp.concatenate([out, h, out, h], axis=1)        # (4B, k)
            lhs = jnp.where(branch_mask(k1), both, 0.0)
            wg = w_ref[lay["gru_off"][l]:lay["gru_off"][l] + k, 0:4 * H]
            gb = b_ref[:, lay["gb_off"][l]:lay["gb_off"][l] + 4 * H]
            g = mm(lhs, wg) + gb                                    # (4B, 4H)
            rz = jax.nn.sigmoid(g[:, 0:2 * H])
            r = rz[:, 0:H]
            z = rz[:, H:2 * H]
            n = jnp.tanh(g[:, 2 * H:3 * H] + r * g[:, 3 * H:4 * H])
            out = (1.0 - z) * n + z * h
            layer_outs.append(out)

        # single lane-dense hidden store (aliased in place with h0)
        hout_ref[...] = (layer_outs[0] if NL == 1
                         else jnp.concatenate(layer_outs, axis=1))

        # ---- complex recombination + fc_out --------------------------------
        # out rows: [Frr; Fir; Fii; Fri];  rotate rows by 2B to line up
        # [Fii; Fri] under [Frr; Fir]; rows 2B:4B become ignored filler.
        G = out
        Grot = jnp.concatenate([G[twoB:fourB, :], G[0:twoB, :]], axis=0)
        row_H = lax.broadcasted_iota(jnp.int32, (fourB, H), 0)
        y = jnp.where(row_H < B, G - Grot, G + Grot)   # rows 0:2B = [y_r ; y_i]

        w2 = w_ref[lay["w2_off"]:lay["w2_off"] + H, 0:2 * F]
        b2 = b_ref[:, lay["b2_off"]:lay["b2_off"] + 2 * F]
        y2 = mm(y, w2) + b2                                         # (4B, 2F)
        zact = prelu(jnp.where(row_F < B, y2[:, 0:F], y2[:, F:2 * F]), a2)

        w3 = w_ref[lay["w3_off"]:lay["w3_off"] + F, 0:2 * L]
        b3 = b_ref[:, lay["b3_off"]:lay["b3_off"] + 2 * L]
        # wrapper reads rows [0:B, 0:L] (real) and [B:2B, L:2L] (imag)
        out_ref[...] = mm(zact, w3) + b3                            # (4B, 2L)

    return kernel


# ---------------------------------------------------------------------------
# Synthetic parameters (same shapes / gate order as KGNet / nn.GRU)
# ---------------------------------------------------------------------------
def init_params(key, L, fc_dim, rnn_layers, rnn_dim):
    Din = 2 * L + 1
    keys = iter(jax.random.split(key, 128))

    def w(shape, scale=0.1):
        return jax.random.normal(next(keys), shape, jnp.float32) * scale

    params = {
        "W1r": w((Din, fc_dim)), "b1r": w((1, fc_dim)),
        "W1i": w((Din, fc_dim)), "b1i": w((1, fc_dim)),
        "a1": jnp.full((1, 1), 0.25, jnp.float32),
        "W2r": w((rnn_dim, fc_dim)), "b2r": w((1, fc_dim)),
        "W2i": w((rnn_dim, fc_dim)), "b2i": w((1, fc_dim)),
        "a2": jnp.full((1, 1), 0.25, jnp.float32),
        "W3r": w((fc_dim, L)), "b3r": w((1, L)),
        "W3i": w((fc_dim, L)), "b3i": w((1, L)),
    }
    gru = []
    for _g in range(2):                                   # gru_r, gru_i
        layers = []
        for l in range(rnn_layers):
            in_dim = fc_dim if l == 0 else rnn_dim
            layers.append(dict(
                Wih=w((3, in_dim, rnn_dim)),              # gates (r, z, n)
                Whh=w((3, rnn_dim, rnn_dim)),
                bih=w((3, 1, rnn_dim)),
                bhh=w((3, 1, rnn_dim)),
            ))
        gru.append(layers)
    params["gru"] = gru
    return params


# ---------------------------------------------------------------------------
# Wrapper-side packing: one bf16 weight blob, one f32 bias blob, SMEM alphas
# ---------------------------------------------------------------------------
def pack_params(params, L, F, H, NL, B):
    lay = make_layout(L, F, H, NL)
    Din = lay["Din"]

    # ---- weight blob ----
    wblob = jnp.zeros((lay["w_rows"], lay["WL"]), jnp.float32)
    w1 = jnp.concatenate([params["W1r"], params["W1i"]], axis=1)    # (Din, 2F)
    w2 = jnp.concatenate([params["W2r"], params["W2i"]], axis=1)    # (H, 2F)
    w3 = jnp.concatenate([params["W3r"], params["W3i"]], axis=1)    # (F, 2L)
    wblob = wblob.at[lay["w1_off"]:lay["w1_off"] + Din, 0:2 * F].set(w1)
    wblob = wblob.at[lay["w2_off"]:lay["w2_off"] + H, 0:2 * F].set(w2)
    wblob = wblob.at[lay["w3_off"]:lay["w3_off"] + F, 0:2 * L].set(w3)

    # GRU: per layer, fused block weight (2*(in+H), 4H):
    #   rows [0:in)       branch-0 Wih -> cols [r | z | n | 0]
    #   rows [in:in+H)    branch-0 Whh -> cols [r | z | 0 | n]
    #   rows [in+H:2in+H) branch-1 Wih, rows [2in+H:) branch-1 Whh
    for l in range(NL):
        in_l = F if l == 0 else H
        blocks = []
        for g in range(2):
            lp = params["gru"][g][l]
            zin = jnp.zeros((in_l, H), jnp.float32)
            zh = jnp.zeros((H, H), jnp.float32)
            wih = jnp.concatenate(
                [lp["Wih"][0], lp["Wih"][1], lp["Wih"][2], zin], axis=1)
            whh = jnp.concatenate(
                [lp["Whh"][0], lp["Whh"][1], zh, lp["Whh"][2]], axis=1)
            blocks.append(jnp.concatenate([wih, whh], axis=0))       # (in+H, 4H)
        wg = jnp.concatenate(blocks, axis=0)                          # (2(in+H), 4H)
        off = lay["gru_off"][l]
        wblob = wblob.at[off:off + wg.shape[0], 0:4 * H].set(wg)
    wblob = wblob.astype(jnp.bfloat16)        # weights only cross into the MXU

    # ---- bias blob (4B rows; gate math stays f32) ----
    bblob = jnp.zeros((4 * B, lay["b_lanes"]), jnp.float32)
    ones4 = jnp.ones((4 * B, 1), jnp.float32)
    ones2 = jnp.ones((2 * B, 1), jnp.float32)
    b1 = jnp.concatenate([params["b1r"], params["b1i"]], axis=1)
    b2 = jnp.concatenate([params["b2r"], params["b2i"]], axis=1)
    b3 = jnp.concatenate([params["b3r"], params["b3i"]], axis=1)
    bblob = bblob.at[:, lay["b1_off"]:lay["b1_off"] + 2 * F].set(ones4 * b1)
    bblob = bblob.at[:, lay["b2_off"]:lay["b2_off"] + 2 * F].set(ones4 * b2)
    bblob = bblob.at[:, lay["b3_off"]:lay["b3_off"] + 2 * L].set(ones4 * b3)
    for l in range(NL):
        rows = []
        for g in range(2):
            lp = params["gru"][g][l]
            gb = jnp.concatenate([lp["bih"][0] + lp["bhh"][0],       # folded r
                                  lp["bih"][1] + lp["bhh"][1],       # folded z
                                  lp["bih"][2],                      # bi_n
                                  lp["bhh"][2]], axis=1)             # bh_n (1,4H)
            rows.append(ones2 * gb)                                  # (2B, 4H)
        gb4 = jnp.concatenate(rows, axis=0)                          # (4B, 4H)
        bblob = bblob.at[:, lay["gb_off"][l]:lay["gb_off"][l] + 4 * H].set(gb4)

    alphas = jnp.concatenate([params["a1"].reshape(1),
                              params["a2"].reshape(1)], axis=0)      # (2,)
    return dict(wblob=wblob, bblob=bblob, alphas=alphas, layout=lay)


# ---------------------------------------------------------------------------
# Forward wrapper
# ---------------------------------------------------------------------------
def kgnet_forward(packed, x, h_rr, h_ir, h_ri, h_ii, *,
                  L, fc_dim, rnn_layers, rnn_dim):
    B = x.shape[0]
    F, H, NL = fc_dim, rnn_dim, rnn_layers
    lay = packed["layout"]
    Din = lay["Din"]

    x_r = jnp.real(x).astype(jnp.float32)
    x_i = jnp.imag(x).astype(jnp.float32)
    # merged row layout: [(gru_r, x_r); (gru_r, x_i); (gru_i, x_i); (gru_i, x_r)]
    x_all = jnp.concatenate([x_r, x_i, x_i, x_r], axis=0)            # (4B, Din)
    if lay["Din_pad"] > Din:
        x_all = jnp.pad(x_all, ((0, 0), (0, lay["Din_pad"] - Din)))

    # packed hidden: rows [h_rr; h_ir; h_ii; h_ri], lanes l*H:(l+1)*H = layer l
    h_all = jnp.concatenate([h_rr, h_ir, h_ii, h_ri], axis=1)        # (NL, 4B, H)
    h0 = jnp.transpose(h_all, (1, 0, 2)).reshape(4 * B, NL * H)

    vmem = pl.BlockSpec(memory_space=pltpu.MemorySpace.VMEM)
    smem = pl.BlockSpec(memory_space=pltpu.MemorySpace.SMEM)

    out_logits, h_new = pl.pallas_call(
        make_kgnet_kernel(B, L, F, H, NL, lay),
        out_shape=(jax.ShapeDtypeStruct((4 * B, 2 * L), jnp.float32),
                   jax.ShapeDtypeStruct((4 * B, NL * H), jnp.float32)),
        in_specs=[vmem, vmem, vmem, vmem, smem],
        out_specs=(vmem, vmem),
        input_output_aliases={1: 1},          # h0 -> hidden output, in place
    )(x_all, h0, packed["wblob"], packed["bblob"], packed["alphas"])

    o_r = out_logits[0:B, 0:L]
    o_i = out_logits[B:2 * B, L:2 * L]
    kg = (o_r + 1j * o_i).astype(jnp.complex64).reshape(B, L, 1)

    hid = h_new.reshape(4 * B, NL, H).transpose(1, 0, 2)             # (NL, 4B, H)
    n_rr = hid[:, 0:B]
    n_ir = hid[:, B:2 * B]
    n_ii = hid[:, 2 * B:3 * B]
    n_ri = hid[:, 3 * B:4 * B]
    return kg, n_rr, n_ir, n_ri, n_ii


# ---------------------------------------------------------------------------
# Pure-JAX reference (mirrors the PyTorch module, unpacked params)
# ---------------------------------------------------------------------------
def kgnet_reference(params, x, h_rr, h_ir, h_ri, h_ii, rnn_layers):
    def dot(a, b):
        return jnp.dot(a, b, precision=lax.Precision.HIGHEST)

    def prelu(v, a):
        return jnp.where(v >= 0, v, a * v)

    a1 = params["a1"][0, 0]
    a2 = params["a2"][0, 0]
    x_r = jnp.real(x).astype(jnp.float32)
    x_i = jnp.imag(x).astype(jnp.float32)
    f_r = prelu(dot(x_r, params["W1r"]) + params["b1r"], a1)
    f_i = prelu(dot(x_i, params["W1i"]) + params["b1i"], a1)

    def gru(layers, x0, h0):
        out, hs = x0, []
        for l in range(rnn_layers):
            lp = layers[l]
            h = h0[l]
            gi = [dot(out, lp["Wih"][k]) + lp["bih"][k] for k in range(3)]
            gh = [dot(h, lp["Whh"][k]) + lp["bhh"][k] for k in range(3)]
            r = jax.nn.sigmoid(gi[0] + gh[0])
            z = jax.nn.sigmoid(gi[1] + gh[1])
            n = jnp.tanh(gi[2] + r * gh[2])
            out = (1.0 - z) * n + z * h
            hs.append(out)
        return out, jnp.stack(hs)

    Frr, n_rr = gru(params["gru"][0], f_r, h_rr)
    Fir, n_ir = gru(params["gru"][0], f_i, h_ir)
    Fri, n_ri = gru(params["gru"][1], f_r, h_ri)
    Fii, n_ii = gru(params["gru"][1], f_i, h_ii)
    y_r, y_i = Frr - Fii, Fri + Fir
    z_r = prelu(dot(y_r, params["W2r"]) + params["b2r"], a2)
    z_i = prelu(dot(y_i, params["W2i"]) + params["b2i"], a2)
    o_r = dot(z_r, params["W3r"]) + params["b3r"]
    o_i = dot(z_i, params["W3i"]) + params["b3i"]
    kg = (o_r + 1j * o_i).astype(jnp.complex64).reshape(x.shape[0], -1, 1)
    return kg, n_rr, n_ir, n_ri, n_ii


if __name__ == "__main__":
    L, fc_dim, rnn_layers, rnn_dim = 8, 32, 2, 32
    B = 2

    key = jax.random.PRNGKey(0)
    kp, kr, ki = jax.random.split(key, 3)
    params = init_params(kp, L, fc_dim, rnn_layers, rnn_dim)
    packed = pack_params(params, L, fc_dim, rnn_dim, rnn_layers, B)

    # complex input feature: (batch, 2L+1)
    x = (jax.random.normal(kr, (B, 2 * L + 1), jnp.float32)
         + 1j * jax.random.normal(ki, (B, 2 * L + 1), jnp.float32)
         ).astype(jnp.complex64)

    # init_hidden(): zero hidden states of shape (rnn_layers, B, rnn_dim)
    h0 = jnp.zeros((rnn_layers, B, rnn_dim), jnp.float32)

    outs = kgnet_forward(packed, x, h0, h0, h0, h0,
                         L=L, fc_dim=fc_dim, rnn_layers=rnn_layers,
                         rnn_dim=rnn_dim)
    kg, n_rr, n_ir, n_ri, n_ii = jax.block_until_ready(outs)

    assert kg.shape == (B, L, 1) and kg.dtype == jnp.complex64
    assert n_rr.shape == (rnn_layers, B, rnn_dim)

    # numerical check against the pure-JAX reference of the PyTorch module
    ref = kgnet_reference(params, x, h0, h0, h0, h0, rnn_layers)
    for got, want in zip((kg, n_rr, n_ir, n_ri, n_ii), ref):
        assert jnp.allclose(got, want, rtol=2e-3, atol=2e-3), (
            float(jnp.max(jnp.abs(got - want))))

    print("KERNEL_OK")
</pallas_src>

<mosaic_0001>
module attributes {stable_mosaic.version = 11 : i64} {
  func.func @kernel(%arg0: memref<8x24xf32, #tpu.memory_space<vmem>>, %arg1: memref<8x64xf32, #tpu.memory_space<vmem>>, %arg2: memref<344x128xbf16, #tpu.memory_space<vmem>>, %arg3: memref<8x640xf32, #tpu.memory_space<vmem>>, %arg4: memref<2xf32, #tpu.memory_space<smem>>, %arg5: memref<8x16xf32, #tpu.memory_space<vmem>>, %arg6: memref<8x64xf32, #tpu.memory_space<vmem>>) attributes {dimension_semantics = [], scalar_prefetch = 0 : i64, scratch_operands = 0 : i64, tpu.core_type = #tpu.core_type<tc>} {
    %c0 = arith.constant 0 : index
    %0 = memref.load %arg4[%c0] : memref<2xf32, #tpu.memory_space<smem>>
    %c1 = arith.constant 1 : index
    %1 = memref.load %arg4[%c1] : memref<2xf32, #tpu.memory_space<smem>>
    %2 = tpu.iota {dimensions = array<i32: 0>} : vector<8x32xi32>
    %c2_i32 = arith.constant 2 : i32
    %3 = vector.broadcast %c2_i32 : i32 to vector<8x32xi32>
    %4 = arith.cmpi slt, %2, %3 : vector<8x32xi32>
    %c6_i32 = arith.constant 6 : i32
    %5 = vector.broadcast %c6_i32 : i32 to vector<8x32xi32>
    %6 = arith.cmpi sge, %2, %5 : vector<8x32xi32>
    %7 = arith.ori %4, %6 : vector<8x32xi1>
    %c256 = arith.constant 256 : index
    %c0_0 = arith.constant 0 : index
    %8 = vector.load %arg2[%c256, %c0_0] : memref<344x128xbf16, #tpu.memory_space<vmem>>, vector<24x64xbf16>
    %c0_1 = arith.constant 0 : index
    %c0_2 = arith.constant 0 : index
    %9 = vector.load %arg3[%c0_1, %c0_2] : memref<8x640xf32, #tpu.memory_space<vmem>>, vector<8x64xf32>
    %c0_3 = arith.constant 0 : index
    %c0_4 = arith.constant 0 : index
    %10 = vector.load %arg0[%c0_3, %c0_4] : memref<8x24xf32, #tpu.memory_space<vmem>>, vector<8x24xf32>
    %11 = arith.truncf %10 : vector<8x24xf32> to vector<8x24xbf16>
    %cst = arith.constant dense<0.000000e+00> : vector<8x64xf32>
    %12 = tpu.matmul %11, %8, %cst {dimension_numbers = #tpu.dot_dimension_numbers<[1], [0], [0], [1], [0, 0, 1, 1], [], []>} : vector<8x24xbf16>, vector<24x64xbf16>, vector<8x64xf32> -> vector<8x64xf32>
    %13 = arith.addf %12, %9 : vector<8x64xf32>
    %14 = vector.extract_strided_slice %13 {offsets = [0, 0], sizes = [8, 32], strides = [1, 1]} : vector<8x64xf32> to vector<8x32xf32>
    %15 = vector.extract_strided_slice %13 {offsets = [0, 32], sizes = [8, 32], strides = [1, 1]} : vector<8x64xf32> to vector<8x32xf32>
    %16 = arith.select %7, %14, %15 : vector<8x32xi1>, vector<8x32xf32>
    %cst_5 = arith.constant 0.000000e+00 : f32
    %17 = vector.broadcast %cst_5 : f32 to vector<8x32xf32>
    %18 = arith.cmpf oge, %16, %17 : vector<8x32xf32>
    %19 = vector.broadcast %0 : f32 to vector<8x32xf32>
    %20 = arith.mulf %19, %16 : vector<8x32xf32>
    %21 = arith.select %18, %16, %20 : vector<8x32xi1>, vector<8x32xf32>
    %c0_6 = arith.constant 0 : index
    %c0_7 = arith.constant 0 : index
    %22 = vector.load %arg1[%c0_6, %c0_7] : memref<8x64xf32, #tpu.memory_space<vmem>>, vector<8x64xf32>
    %23 = vector.extract_strided_slice %22 {offsets = [0, 0], sizes = [8, 32], strides = [1, 1]} : vector<8x64xf32> to vector<8x32xf32>
    %24 = tpu.concatenate %21, %23, %21, %23 in 1 : vector<8x32xf32>, vector<8x32xf32>, vector<8x32xf32>, vector<8x32xf32> -> vector<8x128xf32>
    %25 = tpu.iota {dimensions = array<i32: 0>} : vector<8x128xi32>
    %26 = tpu.iota {dimensions = array<i32: 1>} : vector<8x128xi32>
    %c4_i32 = arith.constant 4 : i32
    %27 = vector.broadcast %c4_i32 : i32 to vector<8x128xi32>
    %28 = arith.cmpi slt, %25, %27 : vector<8x128xi32>
    %c64_i32 = arith.constant 64 : i32
    %29 = vector.broadcast %c64_i32 : i32 to vector<8x128xi32>
    %30 = arith.cmpi slt, %26, %29 : vector<8x128xi32>
    %31 = arith.xori %28, %30 : vector<8x128xi1>
    %cst_8 = arith.constant dense<true> : vector<8x128xi1>
    %32 = arith.xori %31, %cst_8 : vector<8x128xi1>
    %cst_9 = arith.constant 0.000000e+00 : f32
    %33 = vector.broadcast %cst_9 : f32 to vector<8x128xf32>
    %34 = arith.select %32, %24, %33 : vector<8x128xi1>, vector<8x128xf32>
    %c0_10 = arith.constant 0 : index
    %c0_11 = arith.constant 0 : index
    %35 = vector.load %arg2[%c0_10, %c0_11] : memref<344x128xbf16, #tpu.memory_space<vmem>>, vector<128x128xbf16>
    %c0_12 = arith.constant 0 : index
    %c384 = arith.constant 384 : index
    %36 = vector.load %arg3[%c0_12, %c384] : memref<8x640xf32, #tpu.memory_space<vmem>>, vector<8x128xf32>
    %37 = arith.truncf %34 : vector<8x128xf32> to vector<8x128xbf16>
    %cst_13 = arith.constant dense<0.000000e+00> : vector<8x128xf32>
    %38 = tpu.matmul %37, %35, %cst_13 {dimension_numbers = #tpu.dot_dimension_numbers<[1], [0], [0], [1], [0, 0, 1, 1], [], []>} : vector<8x128xbf16>, vector<128x128xbf16>, vector<8x128xf32> -> vector<8x128xf32>
    %39 = arith.addf %38, %36 : vector<8x128xf32>
    %40 = vector.extract_strided_slice %39 {offsets = [0, 0], sizes = [8, 64], strides = [1, 1]} : vector<8x128xf32> to vector<8x64xf32>
    %41 = arith.negf %40 : vector<8x64xf32>
    %42 = math.exp %41 : vector<8x64xf32>
    %cst_14 = arith.constant 1.000000e+00 : f32
    %43 = vector.broadcast %cst_14 : f32 to vector<8x64xf32>
    %44 = arith.addf %43, %42 : vector<8x64xf32>
    %45 = arith.divf %43, %44 : vector<8x64xf32>
    %46 = vector.extract_strided_slice %45 {offsets = [0, 0], sizes = [8, 32], strides = [1, 1]} : vector<8x64xf32> to vector<8x32xf32>
    %47 = vector.extract_strided_slice %45 {offsets = [0, 32], sizes = [8, 32], strides = [1, 1]} : vector<8x64xf32> to vector<8x32xf32>
    %48 = vector.extract_strided_slice %39 {offsets = [0, 64], sizes = [8, 32], strides = [1, 1]} : vector<8x128xf32> to vector<8x32xf32>
    %49 = vector.extract_strided_slice %39 {offsets = [0, 96], sizes = [8, 32], strides = [1, 1]} : vector<8x128xf32> to vector<8x32xf32>
    %50 = arith.mulf %46, %49 : vector<8x32xf32>
    %51 = arith.addf %48, %50 : vector<8x32xf32>
    %52 = math.tanh %51 : vector<8x32xf32>
    %cst_15 = arith.constant 1.000000e+00 : f32
    %53 = vector.broadcast %cst_15 : f32 to vector<8x32xf32>
    %54 = arith.subf %53, %47 : vector<8x32xf32>
    %55 = arith.mulf %54, %52 : vector<8x32xf32>
    %56 = arith.mulf %47, %23 : vector<8x32xf32>
    %57 = arith.addf %55, %56 : vector<8x32xf32>
    %58 = vector.extract_strided_slice %22 {offsets = [0, 32], sizes = [8, 32], strides = [1, 1]} : vector<8x64xf32> to vector<8x32xf32>
    %59 = tpu.concatenate %57, %58, %57, %58 in 1 : vector<8x32xf32>, vector<8x32xf32>, vector<8x32xf32>, vector<8x32xf32> -> vector<8x128xf32>
    %cst_16 = arith.constant 0.000000e+00 : f32
    %60 = vector.broadcast %cst_16 : f32 to vector<8x128xf32>
    %61 = arith.select %32, %59, %60 : vector<8x128xi1>, vector<8x128xf32>
    %c128 = arith.constant 128 : index
    %c0_17 = arith.constant 0 : index
    %62 = vector.load %arg2[%c128, %c0_17] : memref<344x128xbf16, #tpu.memory_space<vmem>>, vector<128x128xbf16>
    %c0_18 = arith.constant 0 : index
    %c512 = arith.constant 512 : index
    %63 = vector.load %arg3[%c0_18, %c512] : memref<8x640xf32, #tpu.memory_space<vmem>>, vector<8x128xf32>
    %64 = arith.truncf %61 : vector<8x128xf32> to vector<8x128xbf16>
    %cst_19 = arith.constant dense<0.000000e+00> : vector<8x128xf32>
    %65 = tpu.matmul %64, %62, %cst_19 {dimension_numbers = #tpu.dot_dimension_numbers<[1], [0], [0], [1], [0, 0, 1, 1], [], []>} : vector<8x128xbf16>, vector<128x128xbf16>, vector<8x128xf32> -> vector<8x128xf32>
    %66 = arith.addf %65, %63 : vector<8x128xf32>
    %67 = vector.extract_strided_slice %66 {offsets = [0, 0], sizes = [8, 64], strides = [1, 1]} : vector<8x128xf32> to vector<8x64xf32>
    %68 = arith.negf %67 : vector<8x64xf32>
    %69 = math.exp %68 : vector<8x64xf32>
    %cst_20 = arith.constant 1.000000e+00 : f32
    %70 = vector.broadcast %cst_20 : f32 to vector<8x64xf32>
    %71 = arith.addf %70, %69 : vector<8x64xf32>
    %72 = arith.divf %70, %71 : vector<8x64xf32>
    %73 = vector.extract_strided_slice %72 {offsets = [0, 0], sizes = [8, 32], strides = [1, 1]} : vector<8x64xf32> to vector<8x32xf32>
    %74 = vector.extract_strided_slice %72 {offsets = [0, 32], sizes = [8, 32], strides = [1, 1]} : vector<8x64xf32> to vector<8x32xf32>
    %75 = vector.extract_strided_slice %66 {offsets = [0, 64], sizes = [8, 32], strides = [1, 1]} : vector<8x128xf32> to vector<8x32xf32>
    %76 = vector.extract_strided_slice %66 {offsets = [0, 96], sizes = [8, 32], strides = [1, 1]} : vector<8x128xf32> to vector<8x32xf32>
    %77 = arith.mulf %73, %76 : vector<8x32xf32>
    %78 = arith.addf %75, %77 : vector<8x32xf32>
    %79 = math.tanh %78 : vector<8x32xf32>
    %cst_21 = arith.constant 1.000000e+00 : f32
    %80 = vector.broadcast %cst_21 : f32 to vector<8x32xf32>
    %81 = arith.subf %80, %74 : vector<8x32xf32>
    %82 = arith.mulf %81, %79 : vector<8x32xf32>
    %83 = arith.mulf %74, %58 : vector<8x32xf32>
    %84 = arith.addf %82, %83 : vector<8x32xf32>
    %85 = tpu.concatenate %57, %84 in 1 : vector<8x32xf32>, vector<8x32xf32> -> vector<8x64xf32>
    %c0_22 = arith.constant 0 : index
    %c0_23 = arith.constant 0 : index
    %86 = vector.load %arg6[%c0_22, %c0_23] : memref<8x64xf32, #tpu.memory_space<vmem>>, vector<8x64xf32>
    tpu.vector_store %arg6[%c0_22, %c0_23], %85 {strides = array<i32>} : memref<8x64xf32, #tpu.memory_space<vmem>>, vector<8x64xf32>,
    %87 = vector.extract_strided_slice %84 {offsets = [4, 0], sizes = [4, 32], strides = [1, 1]} : vector<8x32xf32> to vector<4x32xf32>
    %88 = vector.extract_strided_slice %84 {offsets = [0, 0], sizes = [4, 32], strides = [1, 1]} : vector<8x32xf32> to vector<4x32xf32>
    %89 = tpu.concatenate %87, %88 in 0 : vector<4x32xf32>, vector<4x32xf32> -> vector<8x32xf32>
    %90 = tpu.iota {dimensions = array<i32: 0>} : vector<8x32xi32>
    %c2_i32_24 = arith.constant 2 : i32
    %91 = vector.broadcast %c2_i32_24 : i32 to vector<8x32xi32>
    %92 = arith.cmpi slt, %90, %91 : vector<8x32xi32>
    %93 = arith.subf %84, %89 : vector<8x32xf32>
    %94 = arith.addf %84, %89 : vector<8x32xf32>
    %95 = arith.select %92, %93, %94 : vector<8x32xi1>, vector<8x32xf32>
    %c280 = arith.constant 280 : index
    %c0_25 = arith.constant 0 : index
    %96 = vector.load %arg2[%c280, %c0_25] : memref<344x128xbf16, #tpu.memory_space<vmem>>, vector<32x64xbf16>
    %c0_26 = arith.constant 0 : index
    %c128_27 = arith.constant 128 : index
    %97 = vector.load %arg3[%c0_26, %c128_27] : memref<8x640xf32, #tpu.memory_space<vmem>>, vector<8x64xf32>
    %98 = arith.truncf %95 : vector<8x32xf32> to vector<8x32xbf16>
    %cst_28 = arith.constant dense<0.000000e+00> : vector<8x64xf32>
    %99 = tpu.matmul %98, %96, %cst_28 {dimension_numbers = #tpu.dot_dimension_numbers<[1], [0], [0], [1], [0, 0, 1, 1], [], []>} : vector<8x32xbf16>, vector<32x64xbf16>, vector<8x64xf32> -> vector<8x64xf32>
    %100 = arith.addf %99, %97 : vector<8x64xf32>
    %c2_i32_29 = arith.constant 2 : i32
    %101 = vector.broadcast %c2_i32_29 : i32 to vector<8x32xi32>
    %102 = arith.cmpi slt, %2, %101 : vector<8x32xi32>
    %103 = vector.extract_strided_slice %100 {offsets = [0, 0], sizes = [8, 32], strides = [1, 1]} : vector<8x64xf32> to vector<8x32xf32>
    %104 = vector.extract_strided_slice %100 {offsets = [0, 32], sizes = [8, 32], strides = [1, 1]} : vector<8x64xf32> to vector<8x32xf32>
    %105 = arith.select %102, %103, %104 : vector<8x32xi1>, vector<8x32xf32>
    %cst_30 = arith.constant 0.000000e+00 : f32
    %106 = vector.broadcast %cst_30 : f32 to vector<8x32xf32>
    %107 = arith.cmpf oge, %105, %106 : vector<8x32xf32>
    %108 = vector.broadcast %1 : f32 to vector<8x32xf32>
    %109 = arith.mulf %108, %105 : vector<8x32xf32>
    %110 = arith.select %107, %105, %109 : vector<8x32xi1>, vector<8x32xf32>
    %c312 = arith.constant 312 : index
    %c0_31 = arith.constant 0 : index
    %111 = vector.load %arg2[%c312, %c0_31] : memref<344x128xbf16, #tpu.memory_space<vmem>>, vector<32x16xbf16>
    %c0_32 = arith.constant 0 : index
    %c256_33 = arith.constant 256 : index
    %112 = vector.load %arg3[%c0_32, %c256_33] : memref<8x640xf32, #tpu.memory_space<vmem>>, vector<8x16xf32>
    %113 = arith.truncf %110 : vector<8x32xf32> to vector<8x32xbf16>
    %cst_34 = arith.constant dense<0.000000e+00> : vector<8x16xf32>
    %114 = tpu.matmul %113, %111, %cst_34 {dimension_numbers = #tpu.dot_dimension_numbers<[1], [0], [0], [1], [0, 0, 1, 1], [], []>} : vector<8x32xbf16>, vector<32x16xbf16>, vector<8x16xf32> -> vector<8x16xf32>
    %115 = arith.addf %114, %112 : vector<8x16xf32>
    %c0_35 = arith.constant 0 : index
    %c0_36 = arith.constant 0 : index
    %116 = vector.load %arg5[%c0_35, %c0_36] : memref<8x16xf32, #tpu.memory_space<vmem>>, vector<8x16xf32>
    tpu.vector_store %arg5[%c0_35, %c0_36], %115 {strides = array<i32>} : memref<8x16xf32, #tpu.memory_space<vmem>>, vector<8x16xf32>,
    return
  }
}

</mosaic_0001>

<bundles_post_ra>
// kernel: tpu_custom_call.1
= control target key start
LH: loop header
LB: loop body
LE: loop exit
PB: predicated region body
PF: predicated region fallthrough
CT: control target
= control target key end

     0   :  { %12 = vsyncpa [#allocation3], 0  ;;  %s1143_s0 = inlined_call_operand.vmem [shape: f32[8,24], index: 0, kind: input, shape index: {}]   ;;  %s1144_s1 = inlined_call_operand.hbm [shape: f32[8,64], index: 1, kind: input, shape index: {}, may-alias: {1,6}]   ;;  %s1145_s2 = inlined_call_operand.hbm [shape: bf16[344,128], index: 2, kind: input, shape index: {}]   ;;  %s1146_s3 = inlined_call_operand.hbm [shape: f32[8,640], index: 3, kind: input, shape index: {}]   ;;  %s1147_s4 = inlined_call_operand.vmem [shape: f32[2], index: 4, kind: input, shape index: {}]   ;;  %s1148_s5 = inlined_call_operand.hbm [shape: f32[8,16], index: 5, kind: output, shape index: {0}]   ;;  %s1149_s6 = inlined_call_operand.hbm [shape: f32[8,64], index: 6, kind: output, shape index: {1}, may-alias: {1,6}]  }
   0x1   :  { %13 = vsyncpa [#allocation7], 0 }
   0x2   :  { %14 = vsyncpa [#allocation5], 0 }
   0x3   :  { %15 = vsyncpa [#allocation4], 0 }
   0x4   :  { %16 = vsyncpa [#allocation12], 0  ;;  %s935_s21 = smov [#allocation6]   ;;  %s803_s25 = scalar_lea.hbm %s1145_s2, 2752 }
   0x5   :  { %s34_s22 = sshll.u32 %s935_s21, 4  ;;  %p804_p0 = scmp.ne.s32.totalorder %s1145_s2, %s803_s25  ;;  %s35_s22 = int_to_ptr.vmem [resolvable:$true] %s34_s22 }
   0x6   :  { %p807_p1 = scmp.lt.u32.totalorder %s803_s25, %s1145_s2 }
   0x8   :  { %p809_p2 = pnand %p807_p1, %p804_p0 }
   0xa   :  { %812 = shalt.err (!%p809_p2)
}
   0xb   :  { %s813_s30 = scalar_lea.vmem %s35_s22, 2752  ;;  %p818_p4 = scmp.lt.s32.totalorder %s35_s22, %s35_s22 }
   0xc   :  { %p814_p3 = scmp.ne.s32.totalorder %s35_s22, %s813_s30  ;;  %p819_p5 = scmp.lt.s32.totalorder %s813_s30, %s813_s30 }
   0xe   :  { %p820_p6 = por %p819_p5, %p818_p4 }
  0x10   :  { %p821_p7 = pnand %p820_p6, %p814_p3 }
  0x12   :  { %824 = shalt.err (!%p821_p7)
}
  0x13   :  { %s936_s7 = smov 64   ;;  %s937_s8 = smov 4  }
  0x14   :  { %40 = dma.hbm_to_vmem [thread:$0]  %s1145_s2, 2752, %s35_s22, [#allocation7], %s936_s7, %s936_s7, %s937_s8  }
  0x15   :  { %s938_s11 = smov [#allocation2]   ;;  %s939_s13 = smov [#allocation8]  }
  0x16   :  { %s25_s12 = sshll.u32 %s938_s11, 4  ;;  %s47_s14 = sshll.u32 %s939_s13, 4  ;;  %s26_s12 = int_to_ptr.vmem [resolvable:$true] %s25_s12  ;;  %s48_s14 = int_to_ptr.vmem [resolvable:$true] %s47_s14 }
  0x17   :  { %s825_s17 = scalar_lea.hbm %s1144_s1, 128 }
  0x18   :  { %p826_p8 = scmp.ne.s32.totalorder %s1144_s1, %s825_s17  ;;  %p829_p9 = scmp.lt.u32.totalorder %s825_s17, %s1144_s1 }
  0x1a   :  { %p831_p10 = pnand %p829_p9, %p826_p8 }
  0x1c   :  { %834 = shalt.err (!%p831_p10)
}
  0x1d   :  { %s835_s2 = scalar_lea.vmem %s26_s12, 128  ;;  %p840_p12 = scmp.lt.s32.totalorder %s26_s12, %s26_s12 }
  0x1e   :  { %p836_p11 = scmp.ne.s32.totalorder %s26_s12, %s835_s2  ;;  %p841_p13 = scmp.lt.s32.totalorder %s835_s2, %s835_s2 }
  0x20   :  { %p842_p0 = por %p841_p13, %p840_p12 }
  0x22   :  { %p843_p1 = pnand %p842_p0, %p836_p11 }
  0x24   :  { %846 = shalt.err (!%p843_p1)
}
  0x25   :  { %28 = dma.hbm_to_vmem [thread:$0]  %s1144_s1, 128, %s26_s12, [#allocation3]  }
  0x26   :  { %s57_s26 = sshll.u32 %s1147_s4, 4  ;;  %s847_s29 = scalar_lea.hbm %s1146_s3, 640  ;;  %s58_s26 = int_to_ptr.vmem [resolvable:$true] %s57_s26 }
  0x27   :  { %p848_p2 = scmp.ne.s32.totalorder %s1146_s3, %s847_s29  ;;  %p851_p3 = scmp.lt.u32.totalorder %s847_s29, %s1146_s3 }
  0x29   :  { %p853_p4 = pnand %p851_p3, %p848_p2 }
  0x2b   :  { %856 = shalt.err (!%p853_p4)
}
  0x2c   :  { %s857_s1 = scalar_lea.vmem %s48_s14, 640  ;;  %p862_p6 = scmp.lt.s32.totalorder %s48_s14, %s48_s14 }
  0x2d   :  { %p858_p5 = scmp.ne.s32.totalorder %s48_s14, %s857_s1  ;;  %p863_p7 = scmp.lt.s32.totalorder %s857_s1, %s857_s1 }
  0x2f   :  { %p864_p8 = por %p863_p7, %p862_p6 }
  0x31   :  { %p865_p9 = pnand %p864_p8, %p858_p5 }
  0x33   :  { %868 = shalt.err (!%p865_p9)
}
  0x34   :  { %50 = dma.hbm_to_vmem [thread:$0]  %s1146_s3, 640, %s48_s14, [#allocation7]  }
  0x35   :  { %s869_s12 = scalar_lea.vmem %s58_s26, 16  ;;  %p874_p11 = scmp.lt.s32.totalorder %s58_s26, %s58_s26 }
  0x36   :  { %p870_p10 = scmp.ne.s32.totalorder %s58_s26, %s869_s12  ;;  %p875_p12 = scmp.lt.s32.totalorder %s869_s12, %s869_s12 }
  0x38   :  { %p876_p13 = por %p875_p12, %p874_p11 }
  0x3a   :  { %p877_p0 = pnand %p876_p13, %p870_p10 }
  0x3c   :  { %880 = shalt.err (!%p877_p0)
}
  0x3d   :  { %s940_s13 = smov [#allocation9]  }
  0x3e   :  { %60 = dma.vmem_to_smem %s58_s26, 16, %s940_s13, [#allocation5]  }
  0x3f   :  { %925 = dma.done.wait [#allocation3], 128  }
  0x40   :  { %926 = vsyncadd [#allocation3], 4294967168 }
  0x41   :  { %927 = dma.done.wait [#allocation7], 3392  }
  0x42   :  { %928 = vsyncadd [#allocation7], 4294963904 }
  0x43   :  { %929 = dma.done.wait [#allocation5], 16  }
  0x44   :  { %930 = vsyncadd [#allocation5], 4294967280 }
  0x45   :  { %73 = sfence }
  0x46   :  { %v769_v0 = vld [vmem:[#allocation6 + $0x80] sm:$0xff]   ;;  %v941_v1 = vmov 0.0   ;;  %v770_v2 = vld [vmem:[#allocation6 + $0x88] ss:$0 sps:$4 sm:$0xff]   ;;  %vm101_vm0 = vcmask 1043456   ;;  %vm942_vm1 = vmmov 0   ;;  %v77_v19 = vlaneseq }
  0x47   :  { %692 = vmatprep.subr.bf16.mxu0 %v941_v1  ;;  %700 = vmatprep.subr.bf16.mxu1 %v941_v1  ;;  %v86_v3 = vld [vmem:[%s1143_s0] sm:$0xff]  ;;  %v103_v4 = vsel %vm101_vm0, %v770_v2, 0  ;;  %vm97_vm2 = vcmask 195584   ;;  %v85_v6 = vld [vmem:[#allocation8] sm:$0xff]  ;;  %v771_v7 = vld [vmem:[#allocation6] sm:$0xff]   ;;  %s943_s0 = smov 96  }
  0x48   :  { %693 = vmatpush3.bf16.msra.mxu0 %v769_v0  ;;  %696 = vmatprep.mubr.msk.bf16.mxu0 %vm942_vm1, %v941_v1  ;;  %v87_v5 = vpack.c.bf16 %v86_v3, %v86_v3  ;;  %v772_v9 = vld [vmem:[#allocation6 + $0x8] sm:$0xff]   ;;  %v1039_v14 = vld [vmem:[#allocation2] sm:$0xff]  ;;  %v773_v15 = vld [vmem:[#allocation6 + $0x10] sm:$0xff]   ;;  %s944_s15 = smov 32   ;;  %s75_s16 = sld [smem:[#allocation9]]  ;;  %v1048_v21 = vshrl.u32 %v77_v19, 7 }
  0x49   :  { %694 = vmatprep.subr.bf16.mxu0 %v941_v1  ;;  %716 = vmatprep.mubr.msk.bf16.mxu1 %vm942_vm1, %v941_v1  ;;  %v774_v16 = vld [vmem:[#allocation6 + $0x18] sm:$0xff]   ;;  %v775_v17 = vld [vmem:[#allocation6 + $0x20] sm:$0xff]   ;;  %v776_v18 = vld [vmem:[#allocation6 + $0x28] sm:$0xff]   ;;  %v173_v28 = vand.u32 127, %v77_v19  ;;  %vm166_vm10 = vcmask 261120   ;;  %vm168_vm11 = vcmask 523264  }
  0x4a   :  { %701 = vmatpush3.bf16.msra.mxu1 %v771_v7  ;;  %v777_v20 = vld [vmem:[#allocation6 + $0x30] sm:$0xff]   ;;  %v778_v22 = vld [vmem:[#allocation6 + $0x38] sm:$0xff]   ;;  %vm79_vm3 = vcmp.lt.s32.totalorder %v1048_v21, 2  ;;  %vm80_vm4 = vcmp.ge.s32.totalorder %v1048_v21, 6  ;;  %vm174_vm7 = vcmp.lt.s32.totalorder %v1048_v21, 4  ;;  %vm170_vm12 = vcmask 785408  }
  0x4b   :  { %702 = vmatprep.subr.bf16.mxu1 %v941_v1  ;;  %vm81_vm5 = vmor %vm79_vm3, %vm80_vm4  ;;  %vm175_vm8 = vcmp.lt.s32.totalorder %v173_v28, 64  ;;  %vm945_vm13 = vmmov 1   ;;  %v195_v37 = vld [vmem:[#allocation8 + $0x18] sm:$0xff]  ;;  %v781_v54 = vld [vmem:[#allocation6 + $0x50] sm:$0xff]   ;;  %s946_s17 = smov [#allocation11]  }
  0x4c   :  { %695 = vmatpush3.bf16.msra.mxu0 %v103_v4  ;;  %vm176_vm9 = vmxor %vm174_vm7, %vm175_vm8  ;;  %v779_v51 = vld [vmem:[#allocation6 + $0x40] sm:$0xff]   ;;  %v780_v52 = vld [vmem:[#allocation6 + $0x48] sm:$0xff]   ;;  %s616_s18 = sshll.u32 %s946_s17, 4  ;;  %s617_s18 = int_to_ptr.vmem [resolvable:$true] %s616_s18 }
  0x4d   :  { %720 = vmatprep.subr.bf16.mxu0 %v941_v1  ;;  %vm1060_vm14 = vmxor %vm176_vm9, %vm945_vm13  ;;  %v782_v55 = vld [vmem:[#allocation6 + $0x58] sm:$0xff]   ;;  %v783_v56 = vld [vmem:[#allocation6 + $0x60] sm:$0xff]   ;;  %s881_s19 = scalar_lea.vmem %s617_s18, 128  ;;  %p886_p2 = scmp.lt.s32.totalorder %s617_s18, %s617_s18 }
  0x4e   :  { %703 = vmatpush3.bf16.msra.mxu1 %v772_v9  ;;  %v151_v23 = vstv %s75_s16  ;;  %vm643_vm15 = vmpackc.low %vm1060_vm14, %vm1060_vm14  ;;  %v784_v57 = vld [vmem:[#allocation6 + $0x68] sm:$0xff]   ;;  %v785_v58 = vld [vmem:[#allocation6 + $0x70] sm:$0xff]   ;;  %p882_p1 = scmp.ne.s32.totalorder %s617_s18, %s881_s19  ;;  %p887_p3 = scmp.lt.s32.totalorder %s881_s19, %s881_s19 }
  0x4f   :  { %697 = vmatmul.mubr.msk.bf16.vlgmr.msra.gmra.mrb[0].mxu0 %vm97_vm2, %v87_v5  ;;  %704 = vmatprep.subr.bf16.mxu1 %v941_v1  ;;  %v786_v59 = vld [vmem:[#allocation6 + $0x78] sm:$0xff]   ;;  %v340_v9 = vld [vmem:[#allocation8 + $0x20] sm:$0xff] }
  0x50   :  { %736 = vmatprep.mubr.msk.bf16.mxu0 %vm942_vm1, %v941_v1  ;;  %721 = vmatpush3.bf16.msra.mxu0 %v779_v51  ;;  %p888_p4 = por %p887_p3, %p886_p2 }
  0x51   :  { %722 = vmatprep.subr.bf16.mxu0 %v941_v1 }
  0x52   :  { %705 = vmatpush3.bf16.msra.mxu1 %v773_v15  ;;  %p889_p5 = pnand %p888_p4, %p882_p1 }
  0x53   :  { %706 = vmatprep.subr.bf16.mxu1 %v941_v1 }
  0x54   :  { %723 = vmatpush3.bf16.msra.mxu0 %v780_v52 }
  0x55   :  { %724 = vmatprep.subr.bf16.mxu0 %v941_v1 }
  0x56   :  { %707 = vmatpush3.bf16.msra.mxu1 %v774_v16 }
  0x57   :  { %708 = vmatprep.subr.bf16.mxu1 %v941_v1 }
  0x58   :  { %725 = vmatpush3.bf16.msra.mxu0 %v781_v54 }
  0x59   :  { %726 = vmatprep.subr.bf16.mxu0 %v941_v1 }
  0x5a   :  { %709 = vmatpush3.bf16.msra.mxu1 %v775_v17 }
  0x5b   :  { %710 = vmatprep.subr.bf16.mxu1 %v941_v1 }
  0x5c   :  { %727 = vmatpush3.bf16.msra.mxu0 %v782_v55 }
  0x5d   :  { %728 = vmatprep.subr.bf16.mxu0 %v941_v1 }
  0x5e   :  { %711 = vmatpush3.bf16.msra.mxu1 %v776_v18 }
  0x5f   :  { %712 = vmatprep.subr.bf16.mxu1 %v941_v1 }
  0x60   :  { %729 = vmatpush3.bf16.msra.mxu0 %v783_v56 }
  0x61   :  { %730 = vmatprep.subr.bf16.mxu0 %v941_v1 }
  0x62   :  { %713 = vmatpush3.bf16.msra.mxu1 %v777_v20 }
  0x63   :  { %714 = vmatprep.subr.bf16.mxu1 %v941_v1 }
  0x64   :  { %731 = vmatpush3.bf16.msra.mxu0 %v784_v57 }
  0x65   :  { %732 = vmatprep.subr.bf16.mxu0 %v941_v1 }
  0x66   :  { %715 = vmatpush3.bf16.msra.mxu1 %v778_v22 }
  0x67   :  { %740 = vmatprep.subr.bf16.mxu1 %v941_v1 }
  0x68   :  { %733 = vmatpush3.bf16.msra.mxu0 %v785_v58 }
  0x69   :  { %734 = vmatprep.subr.bf16.mxu0 %v941_v1 }
  0x6c   :  { %735 = vmatpush3.bf16.msra.mxu0 %v786_v59 }
  0x6d   :  { %748 = vmatprep.subr.bf16.mxu0 %v941_v1 }
 0x122   :  { %v139_v8 = vpop.f32.mrb[0].mxu0 }
 0x123   :  { %v140_v10 = vadd.f32 %v139_v8, %v85_v6  ;;  %v698_v11 = vpop.f32.mrb[1].mxu0 }
 0x124   :  { %v142_v12 = vpop.f32.mrb[2].mxu0 }
 0x125   :  { %146 = vrot.lane.b32.xlu0 %v140_v10, %s943_s0  ;;  %v699_v13 = vpop.f32.mrb[3].mxu0 }
 0x129   :  { %156 = vrot.lane.b32.xlu0 %v1039_v14, %s944_s15 }
 0x197   :  { %v147_v24 = vpop.permute.xlu0 %146 }
 0x198   :  { %v149_v25 = vsel %vm81_vm5, %v140_v10, %v147_v24 }
 0x199   :  { %v152_v26 = vmul.f32 %v151_v23, %v149_v25  ;;  %vm150_vm6 = vcmp.ge.f32.partialorder %v149_v25, 0.0 }
 0x19b   :  { %v153_v27 = vsel %vm150_vm6, %v149_v25, %v152_v26  ;;  %v157_v29 = vpop.permute.xlu0 %156  ;;  %v787_v25 = vld [vmem:[#allocation6 + $0x8c] sm:$0xff]  }
 0x19c   :  { %160 = vrot.lane.b32.xlu1 %v153_v27, %s936_s7  ;;  %v167_v32 = vsel %vm166_vm10, %v153_v27, %v157_v29  ;;  %v788_v27 = vld [vmem:[#allocation6 + $0x94] sm:$0xff]  }
 0x1a0   :  { %163 = vrot.lane.b32.xlu1 %v1039_v14, %s943_s0 }
 0x20e   :  { %v161_v30 = vpop.permute.xlu1 %160 }
 0x20f   :  { %v169_v33 = vsel %vm168_vm11, %v167_v32, %v161_v30 }
 0x212   :  { %v164_v34 = vpop.permute.xlu1 %163 }
 0x213   :  { %v171_v35 = vsel %vm170_vm12, %v169_v33, %v164_v34 }
 0x214   :  { %v644_v36 = vpack.c.bf16 %v171_v35, %v171_v35 }
 0x216   :  { %717 = vmatmul.mubr.msk.bf16.vlgmr.msra.gmra.mrb[0].mxu1 %vm643_vm15, %v644_v36 }
 0x217   :  { %744 = vmatprep.mubr.msk.bf16.mxu1 %vm942_vm1, %v941_v1  ;;  %741 = vmatpush3.bf16.msra.mxu1 %v787_v25 }
 0x218   :  { %742 = vmatprep.subr.bf16.mxu1 %v941_v1 }
 0x21b   :  { %743 = vmatpush3.bf16.msra.mxu1 %v788_v27 }
 0x2e9   :  { %v279_v38 = vpop.f32.mrb[0].mxu1 }
 0x2ea   :  { %v280_v39 = vadd.f32 %v279_v38, %v195_v37  ;;  %v718_v40 = vpop.f32.mrb[1].mxu1 }
 0x2eb   :  { %v282_v41 = vpop.f32.mrb[2].mxu1  ;;  %v789_v40 = vld [vmem:[#allocation6 + $0x9c] sm:$0xff]  }
 0x2ec   :  { %292 = vrot.lane.b32.xlu0 %v280_v39, %s944_s15  ;;  %v719_v42 = vpop.f32.mrb[3].mxu1  ;;  %v646_v43 = vmul.f32 -1.442695, %v280_v39  ;;  %v468_v41 = vld [vmem:[#allocation8 + $0x8] sm:$0xff] }
 0x2ee   :  { %791 = vpow2.f32 %v646_v43 }
 0x2f8   :  { %v792_v44 = vpop.eup %791 }
 0x2f9   :  { %v288_v45 = vadd.f32 1.0, %v792_v44 }
 0x2fb   :  { %793 = vrcp.f32 %v288_v45 }
 0x305   :  { %v794_v46 = vpop.eup %793 }
 0x306   :  { %v302_v60 = vsub.f32 1.0, %v794_v46  ;;  %v308_v62 = vmul.f32 %v794_v46, %v157_v29 }
 0x35e   :  { %v293_v47 = vpop.permute.xlu0 %292 }
 0x35f   :  { %v295_v48 = vmul.f32 %v794_v46, %v293_v47 }
 0x361   :  { %297 = vrot.lane.b32.xlu1 %v295_v48, %s936_s7 }
 0x3d3   :  { %v298_v49 = vpop.permute.xlu1 %297 }
 0x3d4   :  { %v300_v50 = vadd.f32 %v298_v49, %v280_v39 }
 0x3d6   :  { %795 = vtanh.f32 %v300_v50 }
 0x3e0   :  { %v796_v53 = vpop.eup %795 }
 0x3e1   :  { %304 = vrot.lane.b32.xlu0 %v796_v53, %s943_s0 }
 0x453   :  { %v305_v61 = vpop.permute.xlu0 %304 }
 0x454   :  { %v307_v63 = vmul.f32 %v305_v61, %v302_v60 }
 0x456   :  { %v309_v0 = vadd.f32 %v308_v62, %v307_v63 }
 0x458   :  { %314 = vrot.lane.b32.xlu0 %v309_v0, %s944_s15  ;;  %311 = vrot.lane.b32.xlu1 %v309_v0, %s943_s0 }
 0x45c   :  { %317 = vrot.lane.b32.xlu1 %v1039_v14, %s936_s7 }
 0x4ca   :  { %v312_v2 = vpop.permute.xlu1 %311  ;;  %v315_v3 = vpop.permute.xlu0 %314 }
 0x4cb   :  { %v320_v4 = vsel %vm166_vm10, %v312_v2, %v1039_v14 }
 0x4cc   :  { %v321_v5 = vsel %vm168_vm11, %v320_v4, %v315_v3 }
 0x4ce   :  { %v318_v6 = vpop.permute.xlu1 %317 }
 0x4cf   :  { %v322_v7 = vsel %vm170_vm12, %v321_v5, %v318_v6 }
 0x4d0   :  { %v656_v8 = vpack.c.bf16 %v322_v7, %v322_v7 }
 0x4d2   :  { %737 = vmatmul.mubr.msk.bf16.vlgmr.msra.gmra.mrb[4].mxu0 %vm643_vm15, %v656_v8 }
 0x4d3   :  { %752 = vmatprep.mubr.msk.bf16.mxu0 %vm942_vm1, %v941_v1  ;;  %749 = vmatpush3.bf16.msra.mxu0 %v789_v40 }
 0x4d4   :  { %750 = vmatprep.subr.bf16.mxu0 %v941_v1 }
 0x5a5   :  { %v424_v10 = vpop.f32.mrb[4].mxu0 }
 0x5a6   :  { %v425_v11 = vadd.f32 %v424_v10, %v340_v9  ;;  %v738_v12 = vpop.f32.mrb[5].mxu0 }
 0x5a7   :  { %v427_v13 = vpop.f32.mrb[6].mxu0 }
 0x5a8   :  { %437 = vrot.lane.b32.xlu0 %v425_v11, %s944_s15  ;;  %v739_v15 = vpop.f32.mrb[7].mxu0  ;;  %v658_v16 = vmul.f32 -1.442695, %v425_v11 }
 0x5aa   :  { %797 = vpow2.f32 %v658_v16 }
 0x5b4   :  { %v798_v17 = vpop.eup %797 }
 0x5b5   :  { %v433_v18 = vadd.f32 1.0, %v798_v17 }
 0x5b7   :  { %799 = vrcp.f32 %v433_v18 }
 0x5c1   :  { %v800_v19 = vpop.eup %799 }
 0x5c2   :  { %v447_v28 = vsub.f32 1.0, %v800_v19  ;;  %v453_v30 = vmul.f32 %v800_v19, %v1039_v14  ;;  %v790_v14 = vld [vmem:[#allocation6 + $0xa4] sm:$0xff]  }
 0x5c3   :  { %751 = vmatpush3.bf16.msra.mxu0 %v790_v14 }
 0x61a   :  { %v438_v20 = vpop.permute.xlu0 %437 }
 0x61b   :  { %v440_v22 = vmul.f32 %v800_v19, %v438_v20 }
 0x61d   :  { %442 = vrot.lane.b32.xlu1 %v440_v22, %s936_s7  ;;  %s631_s7 = sld [smem:[#allocation9 + $0x1]] }
 0x623   :  { %v534_v47 = vstv %s631_s7 }
 0x68f   :  { %v443_v23 = vpop.permute.xlu1 %442 }
 0x690   :  { %v445_v24 = vadd.f32 %v443_v23, %v425_v11 }
 0x692   :  { %801 = vtanh.f32 %v445_v24 }
 0x69c   :  { %v802_v26 = vpop.eup %801 }
 0x69d   :  { %449 = vrot.lane.b32.xlu0 %v802_v26, %s943_s0 }
 0x70f   :  { %v450_v29 = vpop.permute.xlu0 %449 }
 0x710   :  { %v452_v31 = vmul.f32 %v450_v29, %v447_v28 }
 0x712   :  { %v454_v32 = vadd.f32 %v453_v30, %v452_v31 }
 0x714   :  { %v458_v33 = vrot.slane %v454_v32, 4  ;;  %v455_v34 = vsel %vm166_vm10, %v312_v2, %v454_v32 }
 0x715   :  { %456 = vst.msk [vmem:[#allocation11] sm:$0xff] %vm168_vm11, %v455_v34 }
 0x716   :  { %v461_v35 = vsub.f32 %v454_v32, %v458_v33  ;;  %v462_v36 = vadd.f32 %v458_v33, %v454_v32 }
 0x718   :  { %v463_v37 = vsel %vm79_vm3, %v461_v35, %v462_v36 }
 0x719   :  { %v469_v38 = vpack.c.bf16 %v463_v37, %v463_v37 }
 0x71b   :  { %471 = vrot.lane.b32.xlu1 %v469_v38, %s943_s0 }
 0x78d   :  { %v472_v39 = vpop.permute.xlu1 %471 }
 0x78e   :  { %745 = vmatmul.mubr.msk.bf16.vlgmr.msra.gmra.mrb[4].mxu1 %vm166_vm10, %v472_v39 }
 0x861   :  { %v522_v42 = vpop.f32.mrb[4].mxu1 }
 0x862   :  { %v523_v43 = vadd.f32 %v522_v42, %v468_v41  ;;  %v746_v44 = vpop.f32.mrb[5].mxu1 }
 0x863   :  { %v525_v45 = vpop.f32.mrb[6].mxu1 }
 0x864   :  { %529 = vrot.lane.b32.xlu0 %v523_v43, %s943_s0  ;;  %v747_v46 = vpop.f32.mrb[7].mxu1 }
 0x8d6   :  { %v530_v48 = vpop.permute.xlu0 %529 }
 0x8d7   :  { %v532_v49 = vsel %vm79_vm3, %v523_v43, %v530_v48 }
 0x8d8   :  { %vm533_vm0 = vcmp.ge.f32.partialorder %v532_v49, 0.0  ;;  %v535_v50 = vmul.f32 %v534_v47, %v532_v49 }
 0x8da   :  { %v536_v51 = vsel %vm533_vm0, %v532_v49, %v535_v50 }
 0x8db   :  { %v542_v1 = vpack.c.bf16 %v536_v51, %v536_v51 }
 0x8dd   :  { %753 = vmatmul.mubr.msk.bf16.vlgmr.msra.gmra.mrb[8].mxu0 %vm166_vm10, %v542_v1 }
 0x8de   :  { %892 = shalt.err (!%p889_p5)
}
 0x8df   :  { %s893_s2 = scalar_lea.hbm %s1149_s6, 128 }
 0x8e0   :  { %p894_p6 = scmp.ne.s32.totalorder %s1149_s6, %s893_s2  ;;  %p897_p7 = scmp.lt.u32.totalorder %s893_s2, %s1149_s6 }
 0x8e2   :  { %p899_p8 = pnand %p897_p7, %p894_p6 }
 0x8e4   :  { %902 = shalt.err (!%p899_p8)
}
 0x8e5   :  { %619 = dma.vmem_to_hbm [thread:$0]  %s617_s18, 128, %s1149_s6, [#allocation12]   ;;  %v541_v21 = vld [vmem:[#allocation8 + $0x10] sm:$0xff]  ;;  %vm598_vm1 = vcmask 130048  }
 0x8e6   :  { %s947_s28 = smov [#allocation10]  }
 0x8e7   :  { %s606_s29 = sshll.u32 %s947_s28, 4  ;;  %s607_s29 = int_to_ptr.vmem [resolvable:$true] %s606_s29 }
 0x8e8   :  { %s903_s30 = scalar_lea.vmem %s607_s29, 128  ;;  %p908_p10 = scmp.lt.s32.totalorder %s607_s29, %s607_s29 }
 0x8e9   :  { %p904_p9 = scmp.ne.s32.totalorder %s607_s29, %s903_s30  ;;  %p909_p11 = scmp.lt.s32.totalorder %s903_s30, %s903_s30 }
 0x8eb   :  { %p910_p12 = por %p909_p11, %p908_p10 }
 0x8ed   :  { %p911_p13 = pnand %p910_p12, %p904_p9 }
 0x9b0   :  { %v592_v52 = vpop.f32.mrb[8].mxu0 }
 0x9b1   :  { %v593_v53 = vadd.f32 %v592_v52, %v541_v21  ;;  %v754_v54 = vpop.f32.mrb[9].mxu0 }
 0x9b2   :  { %v595_v55 = vpop.f32.mrb[10].mxu0 }
 0x9b3   :  { %v755_v56 = vpop.f32.mrb[11].mxu0  ;;  %599 = vst.msk [vmem:[#allocation10] sm:$0xff] %vm598_vm1, %v593_v53 }
 0x9b4   :  { %914 = shalt.err (!%p911_p13)
}
 0x9b5   :  { %s915_s9 = scalar_lea.hbm %s1148_s5, 128 }
 0x9b6   :  { %p916_p0 = scmp.ne.s32.totalorder %s1148_s5, %s915_s9  ;;  %p919_p1 = scmp.lt.u32.totalorder %s915_s9, %s1148_s5 }
 0x9b8   :  { %p921_p2 = pnand %p919_p1, %p916_p0 }
 0x9ba   :  { %924 = shalt.err (!%p921_p2)
}
 0x9bb   :  { %609 = dma.vmem_to_hbm [thread:$0]  %s607_s29, 128, %s1148_s5, [#allocation4]  }
 0x9bc   :  { %931 = dma.done.wait [#allocation4], 128  }
 0x9bd   :  { %932 = vsyncadd [#allocation4], 4294967168 }
 0x9be   :  { %933 = dma.done.wait [#allocation12], 128  }
 0x9bf   :  { %934 = vsyncadd [#allocation12], 4294967168 }
 0x9c0   :  { %626 = vsyncpa [#allocation3], 1 }
 0x9c1   :  { %627 = vsyncpa [#allocation7], 1 }
 0x9c2   :  { %628 = vsyncpa [#allocation4], 1 }
 0x9c3   :  { %629 = vsyncpa [#allocation12], 1 }
 0x9c4   :  { %630 = vsyncpa [#allocation5], 1 }

</bundles_post_ra>
